<compile_context>
chip_gen: v7x
topology: tpu7x:2x2x1
jax: 0.10.0
libtpu: 0.0.40
codegen_flags: <defaults>
</compile_context>

<pallas_src>
import jax
import jax.numpy as jnp
from jax.experimental import pallas as pl
from jax.experimental.pallas import tpu as pltpu

IN_F = 7            # fc1 in_features
IN_FP = 8           # padded feature dim (ones column folds fc1 bias)
H1 = 32             # fc1 out_features
H2 = 16             # fc2 out_features
OUT_F = IN_F + H2   # concat((rows,7),(rows,16)) -> (rows,23), done in wrapper
LANE = 128


def _round_up(x, m):
    return ((x + m - 1) // m) * m


def triplet_kernel(xt_ref, w1_ref, w2_ref, b2_ref, yt_ref):
    # xt_ref: (IN_FP, tile) -- rows live on the lane axis.
    xt = xt_ref[...]
    # fc1 (+ bias via ones row of xt) and ReLU
    h = jnp.dot(w1_ref[...], xt, preferred_element_type=jnp.float32)   # (32, tile)
    h = jnp.maximum(h, 0.0)
    # dropout(p=0.2): identity in eval mode (inference semantics)
    # fc2
    y = jnp.dot(w2_ref[...], h, preferred_element_type=jnp.float32)    # (16, tile)
    y = y + b2_ref[...]                                                # (16,1) bcast over lanes
    yt_ref[...] = y.astype(yt_ref.dtype)                               # lane-dense store


def _pick_tile(rows, row_tile):
    """Lane-aligned (multiple of 128) row tile; prefer >= 2 grid steps (v7x megacore)."""
    if rows <= LANE:
        return LANE
    half = _round_up(pl.cdiv(rows, 2), LANE)
    return min(_round_up(row_tile, LANE), half)


def triplet_net_forward(anchor, positive, negative, params, *, row_tile=2048):
    w1_aug, w2, b2 = params          # (32,8), (16,32), (16,1)
    n = anchor.shape[0]

    # Fold the three shared-weight branches into the row axis.
    x_full = jnp.concatenate([anchor, positive, negative], axis=0)     # (3N, 7)
    rows = x_full.shape[0]

    tile = _pick_tile(rows, row_tile)
    rows_p = _round_up(rows, tile)
    grid = (rows_p // tile,)

    # Augment with a ones column (folds fc1 bias), pad rows, and transpose so
    # rows sit on the lane (last) axis: xt is (8, rows_p).
    ones = jnp.ones((rows, 1), x_full.dtype)
    x_aug = jnp.concatenate([x_full, ones], axis=1)                    # (3N, 8)
    if rows_p != rows:
        x_aug = jnp.pad(x_aug, ((0, rows_p - rows), (0, 0)))
    xt = x_aug.T                                                       # (8, rows_p)

    yt = pl.pallas_call(
        triplet_kernel,
        out_shape=jax.ShapeDtypeStruct((H2, rows_p), jnp.float32),
        grid=grid,
        in_specs=[
            pl.BlockSpec((IN_FP, tile), lambda i: (0, i)),   # xT row tile (8, tile)
            pl.BlockSpec((H1, IN_FP), lambda i: (0, 0)),     # W1_aug (32, 8)
            pl.BlockSpec((H2, H1), lambda i: (0, 0)),        # W2 (16, 32)
            pl.BlockSpec((H2, 1), lambda i: (0, 0)),         # b2 (16, 1)
        ],
        out_specs=pl.BlockSpec((H2, tile), lambda i: (0, i)),
        compiler_params=pltpu.CompilerParams(
            dimension_semantics=("parallel",)),
    )(xt, w1_aug, w2, b2)

    y = yt[:, :rows].T                                                 # (3N, 16)

    # torch.cat((x_hu, x), dim=1): original input first, fc2 output second.
    out = jnp.concatenate([x_full, y], axis=1)                         # (3N, 23)
    return out[:n], out[n:2 * n], out[2 * n:]


def init_params(key):
    """Deterministic init mirroring torch.nn.Linear default (U(-1/sqrt(fan_in), +)),
    stored in the kernel's transposed/augmented layout."""
    k1, k2, k3, k4 = jax.random.split(key, 4)
    bound1 = 1.0 / jnp.sqrt(IN_F)
    bound2 = 1.0 / jnp.sqrt(H1)
    w1 = jax.random.uniform(k1, (H1, IN_F), jnp.float32, -bound1, bound1)  # (32, 7)
    b1 = jax.random.uniform(k2, (H1, 1), jnp.float32, -bound1, bound1)     # (32, 1)
    w2 = jax.random.uniform(k3, (H2, H1), jnp.float32, -bound2, bound2)    # (16, 32)
    b2 = jax.random.uniform(k4, (H2, 1), jnp.float32, -bound2, bound2)     # (16, 1)
    w1_aug = jnp.concatenate([w1, b1], axis=1)                             # (32, 8)
    return w1_aug, w2, b2


def reference_forward_once(x, params):
    """Pure-JAX reference in the original (row-major) layout."""
    w1_aug, w2, b2 = params
    w1 = w1_aug[:, :IN_F]          # (32, 7)
    b1 = w1_aug[:, IN_F]           # (32,)
    h = jnp.maximum(x @ w1.T + b1, 0.0)
    y = h @ w2.T + b2[:, 0]
    return jnp.concatenate([x, y], axis=1)


def _check(n, key, params):
    ka, kb, kc = jax.random.split(key, 3)
    anchor = jax.random.normal(ka, (n, IN_F), jnp.float32)
    positive = jax.random.normal(kb, (n, IN_F), jnp.float32)
    negative = jax.random.normal(kc, (n, IN_F), jnp.float32)

    out_a, out_p, out_n = triplet_net_forward(anchor, positive, negative, params)
    jax.block_until_ready((out_a, out_p, out_n))

    for out, x in ((out_a, anchor), (out_p, positive), (out_n, negative)):
        ref = reference_forward_once(x, params)
        assert out.shape == (n, OUT_F)
        assert jnp.allclose(out, ref, atol=1e-4, rtol=1e-4)


if __name__ == "__main__":
    key = jax.random.PRNGKey(0)
    kp, k_small, k_big = jax.random.split(key, 3)
    params = init_params(kp)

    # Small batch (single-tile grid).
    _check(8, k_small, params)
    # Slightly larger batch -> exercises the >= 2-step "parallel" grid path.
    _check(100, k_big, params)

    print("KERNEL_OK")
</pallas_src>

<mosaic_0001>
module attributes {stable_mosaic.version = 11 : i64} {
  func.func @triplet_kernel(%arg0: i32, %arg1: memref<8x128xf32, #tpu.memory_space<vmem>>, %arg2: memref<32x8xf32, #tpu.memory_space<vmem>>, %arg3: memref<16x32xf32, #tpu.memory_space<vmem>>, %arg4: memref<16x1xf32, #tpu.memory_space<vmem>>, %arg5: memref<16x128xf32, #tpu.memory_space<vmem>>) attributes {dimension_semantics = [#tpu.dimension_semantics<parallel>], iteration_bounds = array<i64: 1>, scalar_prefetch = 0 : i64, scratch_operands = 0 : i64, tpu.core_type = #tpu.core_type<tc>, window_params = [{transform_indices = @transform_0, window_bounds = array<i64: 8, 128>}, {pipeline_mode = #tpu.pipeline_mode<synchronous>, transform_indices = @transform_1, window_bounds = array<i64: 32, 8>}, {pipeline_mode = #tpu.pipeline_mode<synchronous>, transform_indices = @transform_2, window_bounds = array<i64: 16, 32>}, {pipeline_mode = #tpu.pipeline_mode<synchronous>, transform_indices = @transform_3, window_bounds = array<i64: 16, 1>}, {transform_indices = @transform_4, window_bounds = array<i64: 16, 128>}]} {
    %c0 = arith.constant 0 : index
    %c0_0 = arith.constant 0 : index
    %0 = vector.load %arg1[%c0, %c0_0] : memref<8x128xf32, #tpu.memory_space<vmem>>, vector<8x128xf32>
    %c0_1 = arith.constant 0 : index
    %c0_2 = arith.constant 0 : index
    %1 = vector.load %arg2[%c0_1, %c0_2] : memref<32x8xf32, #tpu.memory_space<vmem>>, vector<32x8xf32>
    %cst = arith.constant dense<0.000000e+00> : vector<32x128xf32>
    %2 = tpu.matmul %1, %0, %cst {dimension_numbers = #tpu.dot_dimension_numbers<[1], [0], [0], [1], [0, 0, 1, 1], [], []>} : vector<32x8xf32>, vector<8x128xf32>, vector<32x128xf32> -> vector<32x128xf32>
    %cst_3 = arith.constant 0.000000e+00 : f32
    %3 = vector.broadcast %cst_3 : f32 to vector<32x128xf32>
    %4 = arith.maximumf %2, %3 : vector<32x128xf32>
    %c0_4 = arith.constant 0 : index
    %c0_5 = arith.constant 0 : index
    %5 = vector.load %arg3[%c0_4, %c0_5] : memref<16x32xf32, #tpu.memory_space<vmem>>, vector<16x32xf32>
    %cst_6 = arith.constant dense<0.000000e+00> : vector<16x128xf32>
    %6 = tpu.matmul %5, %4, %cst_6 {dimension_numbers = #tpu.dot_dimension_numbers<[1], [0], [0], [1], [0, 0, 1, 1], [], []>} : vector<16x32xf32>, vector<32x128xf32>, vector<16x128xf32> -> vector<16x128xf32>
    %c0_7 = arith.constant 0 : index
    %c0_8 = arith.constant 0 : index
    %7 = vector.load %arg4[%c0_7, %c0_8] : memref<16x1xf32, #tpu.memory_space<vmem>>, vector<16x1xf32>
    %8 = vector.broadcast %7 : vector<16x1xf32> to vector<16x128xf32>
    %9 = arith.addf %6, %8 : vector<16x128xf32>
    %c0_9 = arith.constant 0 : index
    %c0_10 = arith.constant 0 : index
    %10 = vector.load %arg5[%c0_9, %c0_10] : memref<16x128xf32, #tpu.memory_space<vmem>>, vector<16x128xf32>
    tpu.vector_store %arg5[%c0_9, %c0_10], %9 {strides = array<i32>} : memref<16x128xf32, #tpu.memory_space<vmem>>, vector<16x128xf32>,
    return
  }
  func.func @transform_0(%arg0: i32) -> (i32, i32) {
    %c0_i32 = arith.constant 0 : i32
    %c0_i32_0 = arith.constant 0 : i32
    return %c0_i32, %arg0 : i32, i32
  }
  func.func @transform_1(%arg0: i32) -> (i32, i32) {
    %c0_i32 = arith.constant 0 : i32
    %c0_i32_0 = arith.constant 0 : i32
    %c0_i32_1 = arith.constant 0 : i32
    return %c0_i32, %c0_i32_0 : i32, i32
  }
  func.func @transform_2(%arg0: i32) -> (i32, i32) {
    %c0_i32 = arith.constant 0 : i32
    %c0_i32_0 = arith.constant 0 : i32
    %c0_i32_1 = arith.constant 0 : i32
    return %c0_i32, %c0_i32_0 : i32, i32
  }
  func.func @transform_3(%arg0: i32) -> (i32, i32) {
    %c0_i32 = arith.constant 0 : i32
    %c0_i32_0 = arith.constant 0 : i32
    %c0_i32_1 = arith.constant 0 : i32
    return %c0_i32, %c0_i32_0 : i32, i32
  }
  func.func @transform_4(%arg0: i32) -> (i32, i32) {
    %c0_i32 = arith.constant 0 : i32
    %c0_i32_0 = arith.constant 0 : i32
    return %c0_i32, %arg0 : i32, i32
  }
}

</mosaic_0001>

<bundles_post_ra>
// kernel: tpu_custom_call.1
= control target key start
LH: loop header
LB: loop body
LE: loop exit
PB: predicated region body
PF: predicated region fallthrough
CT: control target
= control target key end

     0   :  { %vm23_vm0 = vcmask 64512   ;;  %s382_s0 = inlined_call_operand.vmem [shape: f32[8,128], index: 0, kind: input, shape index: {}]   ;;  %s383_s1 = inlined_call_operand.vmem [shape: f32[32,8], index: 1, kind: input, shape index: {}]   ;;  %s384_s2 = inlined_call_operand.vmem [shape: f32[16,32], index: 2, kind: input, shape index: {}]   ;;  %s385_s3 = inlined_call_operand.vmem [shape: f32[16,1], index: 3, kind: input, shape index: {}]   ;;  %s386_s4 = inlined_call_operand.hbm [shape: f32[16,128], index: 4, kind: output, shape index: {}]  }
   0x1   :  { %v18_v0 = vld [vmem:[%s382_s0] sm:$0xff]  ;;  %v20_v2 = vld [vmem:[%s383_s1 + $0x8] sm:$0xff]  ;;  %v21_v3 = vld [vmem:[%s383_s1 + $0x10] sm:$0xff] }
   0x2   :  { %v19_v1 = vld [vmem:[%s383_s1] sm:$0xff]  ;;  %256 = vmatprep.subr.mxu0 %v18_v0 }
   0x3   :  { %258 = vmatprep.mubr.msk.f32.mxu0 %vm23_vm0, %v19_v1 }
   0x4   :  { %9 = vsyncpa [#allocation3], 0  ;;  %257 = vmatpush3.msra.mxu0 %v18_v0  ;;  %v22_v4 = vld [vmem:[%s383_s1 + $0x18] sm:$0xff]  ;;  %v125_v5 = vld [vmem:[%s384_s2] sm:$0xff]  ;;  %vm139_vm1 = vcmask 261120   ;;  %v312_v7 = vmov 0  }
   0x5   :  { %259 = vmatmul.mubr.msk.f32.vlgmr.msra.gmra.mrb[0].mxu0 %vm23_vm0, %v20_v2  ;;  %272 = vmatprep.mubr.msk.f32.mxu1 %vm139_vm1, %v125_v5  ;;  %v127_v6 = vld [vmem:[%s385_s3] sm:$0xff]  ;;  %v128_v8 = vld [vmem:[%s385_s3 + $0x8] sm:$0xff]  ;;  %s313_s3 = smov [#allocation2]  }
   0x6   :  { %261 = vmatprep.mubr.msk.f32.mxu0 %vm23_vm0, %v21_v3  ;;  %287 = vset.pattern.permute.xlu0 %v312_v7  ;;  %v126_v19 = vld [vmem:[%s384_s2 + $0x8] sm:$0xff]  ;;  %s228_s5 = sshll.u32 %s313_s3, 4  ;;  %s229_s5 = int_to_ptr.vmem [resolvable:$true] %s228_s5 }
   0x7   :  { %131 = vperm.xlu0 %287, %v127_v6   ;;  %s288_s6 = scalar_lea.vmem %s229_s5, 256  ;;  %p293_p1 = scmp.lt.s32.totalorder %s229_s5, %s229_s5 }
   0x8   :  { %p289_p0 = scmp.ne.s32.totalorder %s229_s5, %s288_s6  ;;  %p294_p2 = scmp.lt.s32.totalorder %s288_s6, %s288_s6 }
   0x9   :  { %262 = vmatmul.mubr.msk.f32.gmra.mrb[2].mxu0 %vm23_vm0, %v22_v4 }
   0xa   :  { %p295_p3 = por %p294_p2, %p293_p1 }
   0xb   :  { %136 = vperm.xlu0 %287, %v128_v8  }
   0xc   :  { %p296_p4 = pnand %p295_p3, %p289_p0 }
  0x86   :  { %v132_v20 = vpop.permute.xlu0 %131 }
  0x8a   :  { %v137_v21 = vpop.permute.xlu0 %136 }
  0xd8   :  { %v260_v9 = vpop.f32.mrb[0].mxu0 }
  0xd9   :  { %v122_v10 = vmax.f32 %v260_v9, 0.0  ;;  %v102_v11 = vpop.f32.mrb[1].mxu0 }
  0xda   :  { %v121_v12 = vmax.f32 %v102_v11, 0.0 }
  0xdc   :  { %v263_v13 = vpop.f32.mrb[2].mxu0  ;;  %v275_v14 = vpack.c.bf16 %v122_v10, %v121_v12 }
  0xdd   :  { %v124_v15 = vmax.f32 %v263_v13, 0.0  ;;  %v112_v16 = vpop.f32.mrb[3].mxu0 }
  0xde   :  { %v123_v17 = vmax.f32 %v112_v16, 0.0  ;;  %276 = vmatprep.subr.bf16.mxu1 %v275_v14 }
  0xdf   :  { %278 = vmatpush3.bf16.msra.mxu1 %v275_v14 }
  0xe0   :  { %v279_v18 = vpack.c.bf16 %v124_v15, %v123_v17 }
  0xe2   :  { %280 = vmatprep.subr.bf16.mxu1 %v279_v18 }
  0xe3   :  { %282 = vmatpush3.bf16.msra.mxu1 %v279_v18 }
  0xe6   :  { %273 = vmatmul.mubr.msk.f32.vlgmr.msra.gmra.mrb[0].mxu1 %vm139_vm1, %v126_v19 }
 0x1b9   :  { %v274_v22 = vpop.f32.mrb[0].mxu1 }
 0x1ba   :  { %v218_v23 = vadd.f32 %v274_v22, %v137_v21  ;;  %v212_v24 = vpop.f32.mrb[1].mxu1 }
 0x1bb   :  { %v213_v25 = vadd.f32 %v212_v24, %v132_v20 }
 0x1bc   :  { %222 = vst [vmem:[#allocation2 + $0x8] sm:$0xff] %v218_v23 }
 0x1bd   :  { %221 = vst [vmem:[#allocation2] sm:$0xff] %v213_v25 }
 0x1be   :  { %299 = shalt.err (!%p296_p4)
}
 0x1bf   :  { %s300_s8 = scalar_lea.hbm %s386_s4, 256 }
 0x1c0   :  { %p301_p5 = scmp.ne.s32.totalorder %s386_s4, %s300_s8  ;;  %p304_p6 = scmp.lt.u32.totalorder %s300_s8, %s386_s4 }
 0x1c2   :  { %p306_p7 = pnand %p304_p6, %p301_p5 }
 0x1c4   :  { %309 = shalt.err (!%p306_p7)
}
 0x1c5   :  { %s314_s13 = smov 128   ;;  %s315_s14 = smov 8  }
 0x1c6   :  { %234 = dma.vmem_to_hbm [thread:$0]  %s229_s5, 256, %s386_s4, [#allocation3], %s314_s13, %s314_s13, %s315_s14  }
 0x1c7   :  { %310 = dma.done.wait [#allocation3], 256  }
 0x1c8   :  { %311 = vsyncadd [#allocation3], 4294967040 }
 0x1c9   :  { %238 = vsyncpa [#allocation3], 1 }

</bundles_post_ra>
